<compile_context>
chip_gen: v7x
topology: tpu7x:2x2x1
jax: 0.10.0
libtpu: 0.0.40
codegen_flags: <defaults>
</compile_context>

<pallas_src>
import functools

import jax
import jax.numpy as jnp
from jax import lax
from jax.experimental import pallas as pl
from jax.experimental.pallas import tpu as pltpu


def _riid_mlp_kernel(x_ref,
                     w1_ref, b1_ref,
                     w2_ref, b2_ref,
                     w3_ref, b3_ref,
                     w4_ref, b4_ref,
                     o_ref):
    """Fused 4-layer MLP; output is written as a lane-dense (1, block_b) row."""
    x = x_ref[...]

    h = jnp.dot(x, w1_ref[...], preferred_element_type=jnp.float32) + b1_ref[...]
    h = jnp.maximum(h, 0.0)

    h = jnp.dot(h, w2_ref[...], preferred_element_type=jnp.float32) + b2_ref[...]
    h = jnp.maximum(h, 0.0)

    h = jnp.dot(h, w3_ref[...], preferred_element_type=jnp.float32) + b3_ref[...]
    h = jnp.maximum(h, 0.0)

    # Final layer (30 -> 1): contract w4 (1, 30) with h (block_b, 30) over the
    # feature axis (the well-supported transposed-RHS matmul form).  Result is
    # (1, block_b): batch already on lanes, so the store below is unmasked and
    # no standalone transpose/relayout is needed.
    logit = lax.dot_general(
        w4_ref[...], h,
        dimension_numbers=(((1,), (1,)), ((), ())),
        preferred_element_type=jnp.float32,
    ) + b4_ref[...]

    # Sigmoid: exp on the EUP, exact divide (keeps the 1e-5 check honest).
    o_ref[...] = (1.0 / (1.0 + jnp.exp(-logit))).astype(o_ref.dtype)


@functools.partial(jax.jit, static_argnames=("block_b",))
def riid_nn_forward(x, params, *, block_b=2048):
    """x: (B, 4) float32.  params: dict of weights/biases.  Returns (B, 1)."""
    B, F = x.shape
    assert F == 4
    assert block_b % 128 == 0, "block_b must be a multiple of 128 (lane width)"

    # Tile size: big enough to amortize per-step overhead, but never larger
    # than the 128-rounded batch; pad the batch so the grid is exact.
    bb = min(block_b, pl.cdiv(B, 128) * 128)
    Bp = pl.cdiv(B, bb) * bb
    if Bp != B:
        x = jnp.pad(x, ((0, Bp - B), (0, 0)))

    w1, b1 = params["w1"], params["b1"]
    w2, b2 = params["w2"], params["b2"]
    w3, b3 = params["w3"], params["b3"]
    w4, b4 = params["w4"], params["b4"]

    grid = (Bp // bb,)

    # Every weight/bias is tiny and fully resident in VMEM.
    full = lambda shape: pl.BlockSpec(shape, lambda i: (0, 0))

    out = pl.pallas_call(
        _riid_mlp_kernel,
        out_shape=jax.ShapeDtypeStruct((1, Bp), jnp.float32),
        grid_spec=pltpu.PrefetchScalarGridSpec(
            num_scalar_prefetch=0,
            grid=grid,
            in_specs=[
                pl.BlockSpec((bb, 4), lambda i: (i, 0)),   # x tile (batch-tiled)
                full(w1.shape), full(b1.shape),
                full(w2.shape), full(b2.shape),
                full(w3.shape), full(b3.shape),
                full(w4.shape), full(b4.shape),
            ],
            out_specs=pl.BlockSpec((1, bb), lambda i: (0, i)),  # lane-dense row
        ),
        compiler_params=pltpu.CompilerParams(
            dimension_semantics=("parallel",)),  # batch tiles shard across TCs (v7x)
    )(x, w1, b1, w2, b2, w3, b3, w4, b4)

    # (1, Bp) row -> (B, 1) column; drop padded rows.
    return out.reshape(Bp, 1)[:B]


def init_params(key):
    """kaiming_normal_ (fan_in, gain=sqrt(2)) weights, zero biases.

    w1..w3 stored (in, out); w4 stored (out, in) = (1, 30) for the kernel's
    lane-dense final layer.  Biases stored (1, out).
    """
    layer_defs = [
        ("w1", "b1", (4, 10), 4, 10),
        ("w2", "b2", (10, 45), 10, 45),
        ("w3", "b3", (45, 30), 45, 30),
        ("w4", "b4", (1, 30), 30, 1),
    ]
    params = {}
    for wname, bname, wshape, fan_in, fan_out in layer_defs:
        key, sub = jax.random.split(key)
        std = (2.0 / fan_in) ** 0.5
        params[wname] = std * jax.random.normal(sub, wshape, dtype=jnp.float32)
        params[bname] = jnp.zeros((1, fan_out), dtype=jnp.float32)
    return params


def riid_nn_reference(x, params):
    """Pure-JAX reference for correctness checking."""
    h = jnp.maximum(x @ params["w1"] + params["b1"], 0.0)
    h = jnp.maximum(h @ params["w2"] + params["b2"], 0.0)
    h = jnp.maximum(h @ params["w3"] + params["b3"], 0.0)
    return jax.nn.sigmoid(h @ params["w4"].T + params["b4"])


if __name__ == "__main__":
    key = jax.random.PRNGKey(0)
    pkey, xkey = jax.random.split(key)

    params = init_params(pkey)
    x = jax.random.normal(xkey, (16, 4), dtype=jnp.float32)  # (batch=16, in=4)

    out = riid_nn_forward(x, params)
    out = jax.block_until_ready(out)

    ref = riid_nn_reference(x, params)
    assert out.shape == (16, 1), out.shape
    assert jnp.allclose(out, ref, atol=1e-5, rtol=1e-5), "mismatch vs reference"

    print("KERNEL_OK")
</pallas_src>

<mosaic_0001>
module attributes {stable_mosaic.version = 11 : i64} {
  func.func @_riid_mlp_kernel(%arg0: i32, %arg1: memref<128x4xf32, #tpu.memory_space<vmem>>, %arg2: memref<4x10xf32, #tpu.memory_space<vmem>>, %arg3: memref<1x10xf32, #tpu.memory_space<vmem>>, %arg4: memref<10x45xf32, #tpu.memory_space<vmem>>, %arg5: memref<1x45xf32, #tpu.memory_space<vmem>>, %arg6: memref<45x30xf32, #tpu.memory_space<vmem>>, %arg7: memref<1x30xf32, #tpu.memory_space<vmem>>, %arg8: memref<1x30xf32, #tpu.memory_space<vmem>>, %arg9: memref<1x1xf32, #tpu.memory_space<vmem>>, %arg10: memref<1x128xf32, #tpu.memory_space<vmem>>) attributes {dimension_semantics = [#tpu.dimension_semantics<parallel>], iteration_bounds = array<i64: 1>, scalar_prefetch = 0 : i64, scratch_operands = 0 : i64, tpu.core_type = #tpu.core_type<tc>, window_params = [{transform_indices = @transform_0, window_bounds = array<i64: 128, 4>}, {pipeline_mode = #tpu.pipeline_mode<synchronous>, transform_indices = @transform_1, window_bounds = array<i64: 4, 10>}, {pipeline_mode = #tpu.pipeline_mode<synchronous>, transform_indices = @transform_2, window_bounds = array<i64: 1, 10>}, {pipeline_mode = #tpu.pipeline_mode<synchronous>, transform_indices = @transform_3, window_bounds = array<i64: 10, 45>}, {pipeline_mode = #tpu.pipeline_mode<synchronous>, transform_indices = @transform_4, window_bounds = array<i64: 1, 45>}, {pipeline_mode = #tpu.pipeline_mode<synchronous>, transform_indices = @transform_5, window_bounds = array<i64: 45, 30>}, {pipeline_mode = #tpu.pipeline_mode<synchronous>, transform_indices = @transform_6, window_bounds = array<i64: 1, 30>}, {pipeline_mode = #tpu.pipeline_mode<synchronous>, transform_indices = @transform_7, window_bounds = array<i64: 1, 30>}, {pipeline_mode = #tpu.pipeline_mode<synchronous>, transform_indices = @transform_8, window_bounds = array<i64: 1, 1>}, {transform_indices = @transform_9, window_bounds = array<i64: 1, 128>}]} {
    %c0 = arith.constant 0 : index
    %c0_0 = arith.constant 0 : index
    %0 = vector.load %arg1[%c0, %c0_0] : memref<128x4xf32, #tpu.memory_space<vmem>>, vector<128x4xf32>
    %c0_1 = arith.constant 0 : index
    %c0_2 = arith.constant 0 : index
    %1 = vector.load %arg2[%c0_1, %c0_2] : memref<4x10xf32, #tpu.memory_space<vmem>>, vector<4x10xf32>
    %cst = arith.constant dense<0.000000e+00> : vector<128x10xf32>
    %2 = tpu.matmul %0, %1, %cst {dimension_numbers = #tpu.dot_dimension_numbers<[1], [0], [0], [1], [0, 0, 1, 1], [], []>} : vector<128x4xf32>, vector<4x10xf32>, vector<128x10xf32> -> vector<128x10xf32>
    %c0_3 = arith.constant 0 : index
    %c0_4 = arith.constant 0 : index
    %3 = vector.load %arg3[%c0_3, %c0_4] : memref<1x10xf32, #tpu.memory_space<vmem>>, vector<1x10xf32>
    %4 = vector.broadcast %3 : vector<1x10xf32> to vector<128x10xf32>
    %5 = arith.addf %2, %4 : vector<128x10xf32>
    %cst_5 = arith.constant 0.000000e+00 : f32
    %6 = vector.broadcast %cst_5 : f32 to vector<128x10xf32>
    %7 = arith.maximumf %5, %6 : vector<128x10xf32>
    %c0_6 = arith.constant 0 : index
    %c0_7 = arith.constant 0 : index
    %8 = vector.load %arg4[%c0_6, %c0_7] : memref<10x45xf32, #tpu.memory_space<vmem>>, vector<10x45xf32>
    %cst_8 = arith.constant dense<0.000000e+00> : vector<128x45xf32>
    %9 = tpu.matmul %7, %8, %cst_8 {dimension_numbers = #tpu.dot_dimension_numbers<[1], [0], [0], [1], [0, 0, 1, 1], [], []>} : vector<128x10xf32>, vector<10x45xf32>, vector<128x45xf32> -> vector<128x45xf32>
    %c0_9 = arith.constant 0 : index
    %c0_10 = arith.constant 0 : index
    %10 = vector.load %arg5[%c0_9, %c0_10] : memref<1x45xf32, #tpu.memory_space<vmem>>, vector<1x45xf32>
    %11 = vector.broadcast %10 : vector<1x45xf32> to vector<128x45xf32>
    %12 = arith.addf %9, %11 : vector<128x45xf32>
    %cst_11 = arith.constant 0.000000e+00 : f32
    %13 = vector.broadcast %cst_11 : f32 to vector<128x45xf32>
    %14 = arith.maximumf %12, %13 : vector<128x45xf32>
    %c0_12 = arith.constant 0 : index
    %c0_13 = arith.constant 0 : index
    %15 = vector.load %arg6[%c0_12, %c0_13] : memref<45x30xf32, #tpu.memory_space<vmem>>, vector<45x30xf32>
    %cst_14 = arith.constant dense<0.000000e+00> : vector<128x30xf32>
    %16 = tpu.matmul %14, %15, %cst_14 {dimension_numbers = #tpu.dot_dimension_numbers<[1], [0], [0], [1], [0, 0, 1, 1], [], []>} : vector<128x45xf32>, vector<45x30xf32>, vector<128x30xf32> -> vector<128x30xf32>
    %c0_15 = arith.constant 0 : index
    %c0_16 = arith.constant 0 : index
    %17 = vector.load %arg7[%c0_15, %c0_16] : memref<1x30xf32, #tpu.memory_space<vmem>>, vector<1x30xf32>
    %18 = vector.broadcast %17 : vector<1x30xf32> to vector<128x30xf32>
    %19 = arith.addf %16, %18 : vector<128x30xf32>
    %cst_17 = arith.constant 0.000000e+00 : f32
    %20 = vector.broadcast %cst_17 : f32 to vector<128x30xf32>
    %21 = arith.maximumf %19, %20 : vector<128x30xf32>
    %c0_18 = arith.constant 0 : index
    %c0_19 = arith.constant 0 : index
    %22 = vector.load %arg8[%c0_18, %c0_19] : memref<1x30xf32, #tpu.memory_space<vmem>>, vector<1x30xf32>
    %cst_20 = arith.constant dense<0.000000e+00> : vector<1x128xf32>
    %23 = tpu.matmul %22, %21, %cst_20 {dimension_numbers = #tpu.dot_dimension_numbers<[1], [1], [0], [0], [0, 0, 1, 0], [], []>} : vector<1x30xf32>, vector<128x30xf32>, vector<1x128xf32> -> vector<1x128xf32>
    %c0_21 = arith.constant 0 : index
    %c0_22 = arith.constant 0 : index
    %24 = vector.load %arg9[%c0_21, %c0_22] : memref<1x1xf32, #tpu.memory_space<vmem>>, vector<1x1xf32>
    %25 = vector.broadcast %24 : vector<1x1xf32> to vector<1x128xf32>
    %26 = arith.addf %23, %25 : vector<1x128xf32>
    %cst_23 = arith.constant 0.000000e+00 : f32
    %27 = vector.broadcast %cst_23 : f32 to vector<1x128xf32>
    %28 = arith.subf %27, %26 : vector<1x128xf32>
    %29 = math.exp %28 : vector<1x128xf32>
    %cst_24 = arith.constant 1.000000e+00 : f32
    %30 = vector.broadcast %cst_24 : f32 to vector<1x128xf32>
    %31 = arith.addf %30, %29 : vector<1x128xf32>
    %cst_25 = arith.constant 1.000000e+00 : f32
    %32 = vector.broadcast %cst_25 : f32 to vector<1x128xf32>
    %33 = arith.divf %32, %31 : vector<1x128xf32>
    %c0_26 = arith.constant 0 : index
    %c0_27 = arith.constant 0 : index
    %34 = vector.load %arg10[%c0_26, %c0_27] : memref<1x128xf32, #tpu.memory_space<vmem>>, vector<1x128xf32>
    tpu.vector_store %arg10[%c0_26, %c0_27], %33 {strides = array<i32>} : memref<1x128xf32, #tpu.memory_space<vmem>>, vector<1x128xf32>,
    return
  }
  func.func @transform_0(%arg0: i32) -> (i32, i32) {
    %c0_i32 = arith.constant 0 : i32
    %c0_i32_0 = arith.constant 0 : i32
    return %arg0, %c0_i32 : i32, i32
  }
  func.func @transform_1(%arg0: i32) -> (i32, i32) {
    %c0_i32 = arith.constant 0 : i32
    %c0_i32_0 = arith.constant 0 : i32
    %c0_i32_1 = arith.constant 0 : i32
    return %c0_i32, %c0_i32_0 : i32, i32
  }
  func.func @transform_2(%arg0: i32) -> (i32, i32) {
    %c0_i32 = arith.constant 0 : i32
    %c0_i32_0 = arith.constant 0 : i32
    %c0_i32_1 = arith.constant 0 : i32
    return %c0_i32, %c0_i32_0 : i32, i32
  }
  func.func @transform_3(%arg0: i32) -> (i32, i32) {
    %c0_i32 = arith.constant 0 : i32
    %c0_i32_0 = arith.constant 0 : i32
    %c0_i32_1 = arith.constant 0 : i32
    return %c0_i32, %c0_i32_0 : i32, i32
  }
  func.func @transform_4(%arg0: i32) -> (i32, i32) {
    %c0_i32 = arith.constant 0 : i32
    %c0_i32_0 = arith.constant 0 : i32
    %c0_i32_1 = arith.constant 0 : i32
    return %c0_i32, %c0_i32_0 : i32, i32
  }
  func.func @transform_5(%arg0: i32) -> (i32, i32) {
    %c0_i32 = arith.constant 0 : i32
    %c0_i32_0 = arith.constant 0 : i32
    %c0_i32_1 = arith.constant 0 : i32
    return %c0_i32, %c0_i32_0 : i32, i32
  }
  func.func @transform_6(%arg0: i32) -> (i32, i32) {
    %c0_i32 = arith.constant 0 : i32
    %c0_i32_0 = arith.constant 0 : i32
    %c0_i32_1 = arith.constant 0 : i32
    return %c0_i32, %c0_i32_0 : i32, i32
  }
  func.func @transform_7(%arg0: i32) -> (i32, i32) {
    %c0_i32 = arith.constant 0 : i32
    %c0_i32_0 = arith.constant 0 : i32
    %c0_i32_1 = arith.constant 0 : i32
    return %c0_i32, %c0_i32_0 : i32, i32
  }
  func.func @transform_8(%arg0: i32) -> (i32, i32) {
    %c0_i32 = arith.constant 0 : i32
    %c0_i32_0 = arith.constant 0 : i32
    %c0_i32_1 = arith.constant 0 : i32
    return %c0_i32, %c0_i32_0 : i32, i32
  }
  func.func @transform_9(%arg0: i32) -> (i32, i32) {
    %c0_i32 = arith.constant 0 : i32
    %c0_i32_0 = arith.constant 0 : i32
    return %c0_i32, %arg0 : i32, i32
  }
}

</mosaic_0001>

<bundles_post_ra>
// kernel: riid_nn_forward.1
= control target key start
LH: loop header
LB: loop body
LE: loop exit
PB: predicated region body
PF: predicated region fallthrough
CT: control target
= control target key end

     0   :  { %vm107_vm0 = vcmask 1043456   ;;  %vm58_vm1 = vcmask 31744   ;;  %vm330_vm2 = vcmask 1041408   ;;  %vm1198_vm3 = vmmov 1   ;;  %s1427_s1 = inlined_call_operand.vmem [shape: f32[4,10], index: 1, kind: input, shape index: {}]   ;;  %s1428_s0 = inlined_call_operand.vmem [shape: f32[128,4], index: 0, kind: input, shape index: {}]   ;;  %s1429_s3 = inlined_call_operand.vmem [shape: f32[10,45], index: 3, kind: input, shape index: {}]   ;;  %s1430_s5 = inlined_call_operand.vmem [shape: f32[45,30], index: 5, kind: input, shape index: {}]   ;;  %s1431_s2 = inlined_call_operand.vmem [shape: f32[1,10], index: 2, kind: input, shape index: {}]   ;;  %s1432_s4 = inlined_call_operand.vmem [shape: f32[1,45], index: 4, kind: input, shape index: {}]   ;;  %s1433_s8 = inlined_call_operand.<no memory space> [shape: f32[1,1], index: 8, kind: input, shape index: {}]   ;;  %s1434_s6 = inlined_call_operand.vmem [shape: f32[1,30], index: 6, kind: input, shape index: {}]   ;;  %s1435_s7 = inlined_call_operand.vmem [shape: f32[1,30], index: 7, kind: input, shape index: {}]   ;;  %s1436_s9 = inlined_call_operand.vmem [shape: f32[1,128], index: 9, kind: output, shape index: {}]  }
   0x1   :  { %v50_v0 = vld [vmem:[%s1427_s1] sm:$0xf]  ;;  %v35_v2 = vld [vmem:[%s1428_s0 + $0x8] sm:$0xff]  ;;  %v36_v3 = vld [vmem:[%s1428_s0 + $0x10] sm:$0xff]  ;;  %vm557_vm5 = vcmask 1044480   ;;  %vm281_vm7 = vcmask 80896  }
   0x2   :  { %v34_v1 = vld [vmem:[%s1428_s0] sm:$0xff]  ;;  %1011 = vmatprep.subr.msk.mxu0 %vm107_vm0, %v50_v0  ;;  %v37_v4 = vld [vmem:[%s1428_s0 + $0x18] sm:$0xff]  ;;  %v39_v6 = vld [vmem:[%s1428_s0 + $0x28] sm:$0xff]  ;;  %vm508_vm8 = vcmask 367616   ;;  %vm1200_vm9 = vmmov 0   ;;  %vm733_vm10 = vcmask 244736  }
   0x3   :  { %1013 = vmatprep.mubr.msk.f32.mxu0 %vm58_vm1, %v34_v1  ;;  %1012 = vmatpush3.msk.msra.mxu0 %vm107_vm0, %v50_v0  ;;  %v38_v5 = vld [vmem:[%s1428_s0 + $0x20] sm:$0xff]  ;;  %v40_v7 = vld [vmem:[%s1428_s0 + $0x30] sm:$0xff]  ;;  %v41_v8 = vld [vmem:[%s1428_s0 + $0x38] sm:$0xff] }
   0x4   :  { %1014 = vmatmul.mubr.msk.f32.vlgmr.msra.gmra.mrb[0].mxu0 %vm58_vm1, %v35_v2  ;;  %v42_v9 = vld [vmem:[%s1428_s0 + $0x40] sm:$0xff]  ;;  %v43_v10 = vld [vmem:[%s1428_s0 + $0x48] sm:$0xff]  ;;  %v44_v11 = vld [vmem:[%s1428_s0 + $0x50] sm:$0xff] }
   0x5   :  { %1016 = vmatprep.mubr.msk.f32.mxu0 %vm58_vm1, %v36_v3  ;;  %v45_v12 = vld [vmem:[%s1428_s0 + $0x58] sm:$0xff]  ;;  %v46_v13 = vld [vmem:[%s1428_s0 + $0x60] sm:$0xff]  ;;  %v47_v14 = vld [vmem:[%s1428_s0 + $0x68] sm:$0xff] }
   0x6   :  { %v48_v15 = vld [vmem:[%s1428_s0 + $0x70] sm:$0xff]  ;;  %v49_v16 = vld [vmem:[%s1428_s0 + $0x78] sm:$0xff]  ;;  %v272_v17 = vld [vmem:[%s1429_s3] sm:$0xff] }
   0x7   :  { %v273_v18 = vld [vmem:[%s1429_s3 + $0x8] sm:$0x3]  ;;  %vm1137_vm4 = vmpackc.low %vm330_vm2, %vm1198_vm3  ;;  %v495_v20 = vld [vmem:[%s1430_s5] sm:$0xff] }
   0x8   :  { %1017 = vmatmul.mubr.msk.f32.gmra.mrb[2].mxu0 %vm58_vm1, %v37_v4  ;;  %v1136_v19 = vpack.c.bf16 %v273_v18, %v272_v17  ;;  %v496_v21 = vld [vmem:[%s1430_s5 + $0x8] sm:$0xff]  ;;  %v497_v22 = vld [vmem:[%s1430_s5 + $0x10] sm:$0xff]  ;;  %v498_v24 = vld [vmem:[%s1430_s5 + $0x18] sm:$0xff] }
   0x9   :  { %1019 = vmatprep.mubr.msk.f32.mxu0 %vm58_vm1, %v38_v5  ;;  %v1142_v23 = vpack.c.bf16 %v496_v21, %v495_v20  ;;  %v1146_v25 = vpack.c.bf16 %v498_v24, %v497_v22  ;;  %v499_v26 = vld [vmem:[%s1430_s5 + $0x20] sm:$0xff]  ;;  %v500_v27 = vld [vmem:[%s1430_s5 + $0x28] sm:$0x1f]  ;;  %vm1151_vm6 = vmpackc.low %vm557_vm5, %vm1198_vm3 }
   0xa   :  { %1138 = vmatprep.subr.msk.bf16.mxu1 %vm1137_vm4, %v1136_v19  ;;  %v1150_v28 = vpack.c.bf16 %v500_v27, %v499_v26  ;;  %v866_v29 = vld [vmem:[%s1431_s2] ss:$0 sm:$0xff]  ;;  %vm1393_vm11 = vmpackc.low %vm733_vm10, %vm733_vm10 }
   0xb   :  { %1141 = vmatpush3.bf16.msk.msra.mxu1 %vm1137_vm4, %v1136_v19  ;;  %1143 = vmatprep.subr.bf16.mxu0 %v1142_v23 }
   0xc   :  { %1020 = vmatmul.mubr.msk.f32.gmra.mrb[4].mxu0 %vm58_vm1, %v39_v6 }
   0xd   :  { %1022 = vmatprep.mubr.msk.f32.mxu0 %vm58_vm1, %v40_v7  ;;  %1145 = vmatpush3.bf16.msra.mxu0 %v1142_v23 }
   0xe   :  { %1147 = vmatprep.subr.bf16.mxu0 %v1146_v25 }
  0x10   :  { %1023 = vmatmul.mubr.msk.f32.gmra.mrb[6].mxu0 %vm58_vm1, %v41_v8 }
  0x11   :  { %1025 = vmatprep.mubr.msk.f32.mxu0 %vm58_vm1, %v42_v9  ;;  %1149 = vmatpush3.bf16.msra.mxu0 %v1146_v25 }
  0x12   :  { %1152 = vmatprep.subr.msk.bf16.mxu0 %vm1151_vm6, %v1150_v28 }
  0x14   :  { %1026 = vmatmul.mubr.msk.f32.gmra.mrb[8].mxu0 %vm58_vm1, %v43_v10 }
  0x15   :  { %1028 = vmatprep.mubr.msk.f32.mxu0 %vm58_vm1, %v44_v11  ;;  %1155 = vmatpush3.bf16.msk.msra.mxu0 %vm1151_vm6, %v1150_v28 }
  0x18   :  { %1029 = vmatmul.mubr.msk.f32.gmra.mrb[10].mxu0 %vm58_vm1, %v45_v12 }
  0x19   :  { %1031 = vmatprep.mubr.msk.f32.mxu0 %vm58_vm1, %v46_v13 }
  0x1c   :  { %1032 = vmatmul.mubr.msk.f32.gmra.mrb[12].mxu0 %vm58_vm1, %v47_v14  ;;  %v884_v14 = vld [vmem:[%s1432_s4] ss:$0 sm:$0xff] }
  0x1d   :  { %1034 = vmatprep.mubr.msk.f32.mxu0 %vm58_vm1, %v48_v15 }
  0x20   :  { %1035 = vmatmul.mubr.msk.f32.gmra.mrb[14].mxu0 %vm58_vm1, %v49_v16 }
  0xd7   :  { %v1015_v30 = vpop.f32.mrb[0].mxu0 }
  0xd8   :  { %v183_v31 = vadd.f32 %v1015_v30, %v866_v29  ;;  %v177_v32 = vpop.f32.mrb[1].mxu0 }
  0xd9   :  { %v178_v33 = vadd.f32 %v866_v29, %v177_v32 }
  0xda   :  { %v257_v36 = vmax.f32 %v183_v31, 0.0 }
  0xdb   :  { %v256_v34 = vmax.f32 %v178_v33, 0.0  ;;  %v1018_v35 = vpop.f32.mrb[2].mxu0 }
  0xdc   :  { %v193_v37 = vadd.f32 %v1018_v35, %v866_v29  ;;  %v187_v38 = vpop.f32.mrb[3].mxu0 }
  0xdd   :  { %v188_v39 = vadd.f32 %v866_v29, %v187_v38  ;;  %1041 = vmatprep.mubr.msk.f32.mxu1 %vm281_vm7, %v256_v34 }
  0xde   :  { %v259_v40 = vmax.f32 %v193_v37, 0.0  ;;  %1042 = vmatmul.mubr.msk.f32.vlgmr.msra.gmra.mrb[0].mxu1 %vm281_vm7, %v257_v36 }
  0xdf   :  { %v258_v41 = vmax.f32 %v188_v39, 0.0  ;;  %v1021_v42 = vpop.f32.mrb[4].mxu0 }
  0xe0   :  { %v203_v43 = vadd.f32 %v1021_v42, %v866_v29  ;;  %v197_v44 = vpop.f32.mrb[5].mxu0 }
  0xe1   :  { %1044 = vmatprep.mubr.msk.f32.mxu1 %vm281_vm7, %v258_v41  ;;  %v198_v45 = vadd.f32 %v866_v29, %v197_v44 }
  0xe2   :  { %v261_v46 = vmax.f32 %v203_v43, 0.0  ;;  %1045 = vmatmul.mubr.msk.f32.gmra.mrb[2].mxu1 %vm281_vm7, %v259_v40 }
  0xe3   :  { %v260_v47 = vmax.f32 %v198_v45, 0.0  ;;  %v1024_v48 = vpop.f32.mrb[6].mxu0 }
  0xe4   :  { %v213_v49 = vadd.f32 %v1024_v48, %v866_v29  ;;  %v207_v50 = vpop.f32.mrb[7].mxu0 }
  0xe5   :  { %1047 = vmatprep.mubr.msk.f32.mxu1 %vm281_vm7, %v260_v47  ;;  %v208_v51 = vadd.f32 %v866_v29, %v207_v50 }
  0xe6   :  { %1048 = vmatmul.mubr.msk.f32.gmra.mrb[4].mxu1 %vm281_vm7, %v261_v46  ;;  %v263_v52 = vmax.f32 %v213_v49, 0.0 }
  0xe7   :  { %v262_v53 = vmax.f32 %v208_v51, 0.0  ;;  %v1027_v54 = vpop.f32.mrb[8].mxu0 }
  0xe8   :  { %v223_v55 = vadd.f32 %v1027_v54, %v866_v29  ;;  %v217_v56 = vpop.f32.mrb[9].mxu0 }
  0xe9   :  { %1050 = vmatprep.mubr.msk.f32.mxu1 %vm281_vm7, %v262_v53  ;;  %v218_v57 = vadd.f32 %v866_v29, %v217_v56 }
  0xea   :  { %1051 = vmatmul.mubr.msk.f32.gmra.mrb[6].mxu1 %vm281_vm7, %v263_v52  ;;  %v265_v58 = vmax.f32 %v223_v55, 0.0 }
  0xeb   :  { %v264_v59 = vmax.f32 %v218_v57, 0.0  ;;  %v1030_v60 = vpop.f32.mrb[10].mxu0 }
  0xec   :  { %v233_v61 = vadd.f32 %v1030_v60, %v866_v29  ;;  %v227_v62 = vpop.f32.mrb[11].mxu0 }
  0xed   :  { %1053 = vmatprep.mubr.msk.f32.mxu1 %vm281_vm7, %v264_v59  ;;  %v228_v63 = vadd.f32 %v866_v29, %v227_v62 }
  0xee   :  { %1054 = vmatmul.mubr.msk.f32.gmra.mrb[8].mxu1 %vm281_vm7, %v265_v58  ;;  %v267_v0 = vmax.f32 %v233_v61, 0.0 }
  0xef   :  { %v266_v1 = vmax.f32 %v228_v63, 0.0  ;;  %v1033_v2 = vpop.f32.mrb[12].mxu0  ;;  %v1199_v63 = vmov 0.0|0.0  }
  0xf0   :  { %v243_v3 = vadd.f32 %v1033_v2, %v866_v29  ;;  %v237_v4 = vpop.f32.mrb[13].mxu0  ;;  %1156 = vmatprep.subr.bf16.mxu1 %v1199_v63  ;;  %v14_v2 = vstv %s1433_s8 }
  0xf1   :  { %1056 = vmatprep.mubr.msk.f32.mxu1 %vm281_vm7, %v266_v1  ;;  %v238_v5 = vadd.f32 %v866_v29, %v237_v4  ;;  %v1202_v1 = vmov 0   ;;  %15 = vst [vmem:[#allocation2] sm:$0x1] %v14_v2  ;;  %v902_v4 = vld [vmem:[%s1434_s6] ss:$0 sm:$0xff] }
  0xf2   :  { %1057 = vmatmul.mubr.msk.f32.gmra.mrb[10].mxu1 %vm281_vm7, %v267_v0  ;;  %v269_v6 = vmax.f32 %v243_v3, 0.0  ;;  %v1201_v0 = vmov 0.0   ;;  %1193 = vset.pattern.permute.xlu0 %v1202_v1 }
  0xf3   :  { %v268_v7 = vmax.f32 %v238_v5, 0.0  ;;  %v1036_v8 = vpop.f32.mrb[14].mxu0 }
  0xf4   :  { %v253_v9 = vadd.f32 %v1036_v8, %v866_v29  ;;  %v247_v10 = vpop.f32.mrb[15].mxu0 }
  0xf5   :  { %1059 = vmatprep.mubr.msk.f32.mxu1 %vm281_vm7, %v268_v7  ;;  %v248_v11 = vadd.f32 %v866_v29, %v247_v10 }
  0xf6   :  { %1060 = vmatmul.mubr.msk.f32.gmra.mrb[12].mxu1 %vm281_vm7, %v269_v6  ;;  %v271_v12 = vmax.f32 %v253_v9, 0.0 }
  0xf7   :  { %v270_v13 = vmax.f32 %v248_v11, 0.0 }
  0xf8   :  { %v723_v3 = vld [vmem:[#allocation2] sm:$0x1] }
  0xf9   :  { %1062 = vmatprep.mubr.msk.f32.mxu1 %vm281_vm7, %v270_v13  ;;  %726 = vperm.xlu0 %1193, %v723_v3  }
  0xfa   :  { %1063 = vmatmul.mubr.msk.f32.gmra.mrb[14].mxu1 %vm281_vm7, %v271_v12 }
  0xfb   :  { %1133 = vmatprep.mubr.msk.f32.mxu1 %vm1200_vm9, %v1201_v0  ;;  %v729_v0 = vlaneseq }
  0xfd   :  { %v730_v1 = vshrl.u32 %v729_v0, 7 }
  0xff   :  { %v731_v2 = vsub.s32 0, %v730_v1 }
 0x178   :  { %v727_v3 = vpop.permute.xlu0 %726 }
 0x1b1   :  { %v1043_v15 = vpop.f32.mrb[0].mxu1 }
 0x1b2   :  { %v406_v16 = vadd.f32 %v1043_v15, %v884_v14  ;;  %v400_v17 = vpop.f32.mrb[1].mxu1 }
 0x1b3   :  { %v401_v18 = vadd.f32 %v884_v14, %v400_v17 }
 0x1b4   :  { %v480_v21 = vmax.f32 %v406_v16, 0.0 }
 0x1b5   :  { %v479_v19 = vmax.f32 %v401_v18, 0.0  ;;  %v1046_v20 = vpop.f32.mrb[2].mxu1 }
 0x1b6   :  { %v416_v22 = vadd.f32 %v1046_v20, %v884_v14  ;;  %v410_v23 = vpop.f32.mrb[3].mxu1 }
 0x1b7   :  { %v411_v24 = vadd.f32 %v884_v14, %v410_v23  ;;  %1077 = vmatprep.mubr.msk.f32.mxu0 %vm508_vm8, %v479_v19 }
 0x1b8   :  { %v482_v25 = vmax.f32 %v416_v22, 0.0  ;;  %1078 = vmatmul.mubr.msk.f32.vlgmr.msra.gmra.mrb[16].mxu0 %vm508_vm8, %v480_v21 }
 0x1b9   :  { %v481_v26 = vmax.f32 %v411_v24, 0.0  ;;  %v1049_v27 = vpop.f32.mrb[4].mxu1 }
 0x1ba   :  { %v426_v28 = vadd.f32 %v1049_v27, %v884_v14  ;;  %v420_v29 = vpop.f32.mrb[5].mxu1 }
 0x1bb   :  { %1080 = vmatprep.mubr.msk.f32.mxu0 %vm508_vm8, %v481_v26  ;;  %v421_v30 = vadd.f32 %v884_v14, %v420_v29 }
 0x1bc   :  { %v484_v31 = vmax.f32 %v426_v28, 0.0  ;;  %1081 = vmatmul.mubr.msk.f32.gmra.mrb[18].mxu0 %vm508_vm8, %v482_v25 }
 0x1bd   :  { %v483_v32 = vmax.f32 %v421_v30, 0.0  ;;  %v1052_v33 = vpop.f32.mrb[6].mxu1 }
 0x1be   :  { %v436_v34 = vadd.f32 %v1052_v33, %v884_v14  ;;  %v430_v35 = vpop.f32.mrb[7].mxu1 }
 0x1bf   :  { %1083 = vmatprep.mubr.msk.f32.mxu0 %vm508_vm8, %v483_v32  ;;  %v431_v36 = vadd.f32 %v884_v14, %v430_v35 }
 0x1c0   :  { %1084 = vmatmul.mubr.msk.f32.gmra.mrb[20].mxu0 %vm508_vm8, %v484_v31  ;;  %v486_v37 = vmax.f32 %v436_v34, 0.0 }
 0x1c1   :  { %v485_v38 = vmax.f32 %v431_v36, 0.0  ;;  %v1055_v39 = vpop.f32.mrb[8].mxu1 }
 0x1c2   :  { %v446_v40 = vadd.f32 %v1055_v39, %v884_v14  ;;  %v440_v41 = vpop.f32.mrb[9].mxu1 }
 0x1c3   :  { %1086 = vmatprep.mubr.msk.f32.mxu0 %vm508_vm8, %v485_v38  ;;  %v441_v42 = vadd.f32 %v884_v14, %v440_v41 }
 0x1c4   :  { %1087 = vmatmul.mubr.msk.f32.gmra.mrb[22].mxu0 %vm508_vm8, %v486_v37  ;;  %v488_v43 = vmax.f32 %v446_v40, 0.0 }
 0x1c5   :  { %v487_v44 = vmax.f32 %v441_v42, 0.0  ;;  %v1058_v45 = vpop.f32.mrb[10].mxu1 }
 0x1c6   :  { %v456_v46 = vadd.f32 %v1058_v45, %v884_v14  ;;  %v450_v47 = vpop.f32.mrb[11].mxu1 }
 0x1c7   :  { %1089 = vmatprep.mubr.msk.f32.mxu0 %vm508_vm8, %v487_v44  ;;  %v451_v48 = vadd.f32 %v884_v14, %v450_v47 }
 0x1c8   :  { %1090 = vmatmul.mubr.msk.f32.gmra.mrb[24].mxu0 %vm508_vm8, %v488_v43  ;;  %v490_v49 = vmax.f32 %v456_v46, 0.0 }
 0x1c9   :  { %v489_v50 = vmax.f32 %v451_v48, 0.0  ;;  %v1061_v51 = vpop.f32.mrb[12].mxu1 }
 0x1ca   :  { %v466_v52 = vadd.f32 %v1061_v51, %v884_v14  ;;  %v460_v53 = vpop.f32.mrb[13].mxu1 }
 0x1cb   :  { %1092 = vmatprep.mubr.msk.f32.mxu0 %vm508_vm8, %v489_v50  ;;  %v461_v54 = vadd.f32 %v884_v14, %v460_v53 }
 0x1cc   :  { %1093 = vmatmul.mubr.msk.f32.gmra.mrb[26].mxu0 %vm508_vm8, %v490_v49  ;;  %v492_v55 = vmax.f32 %v466_v52, 0.0 }
 0x1cd   :  { %v491_v56 = vmax.f32 %v461_v54, 0.0  ;;  %v1064_v57 = vpop.f32.mrb[14].mxu1 }
 0x1ce   :  { %v476_v58 = vadd.f32 %v1064_v57, %v884_v14  ;;  %v470_v59 = vpop.f32.mrb[15].mxu1 }
 0x1cf   :  { %1095 = vmatprep.mubr.msk.f32.mxu0 %vm508_vm8, %v491_v56  ;;  %v471_v60 = vadd.f32 %v884_v14, %v470_v59 }
 0x1d0   :  { %1096 = vmatmul.mubr.msk.f32.gmra.mrb[28].mxu0 %vm508_vm8, %v492_v55  ;;  %v494_v61 = vmax.f32 %v476_v58, 0.0 }
 0x1d1   :  { %v493_v62 = vmax.f32 %v471_v60, 0.0 }
 0x1d3   :  { %1098 = vmatprep.mubr.msk.f32.mxu0 %vm508_vm8, %v493_v62  ;;  %v722_v62 = vld [vmem:[%s1435_s7] sm:$0x1] }
 0x1d4   :  { %1099 = vmatmul.mubr.msk.f32.gmra.mrb[30].mxu0 %vm508_vm8, %v494_v61 }
 0x28b   :  { %v1079_v5 = vpop.f32.mrb[16].mxu0 }
 0x28c   :  { %v633_v6 = vadd.f32 %v1079_v5, %v902_v4  ;;  %v627_v7 = vpop.f32.mrb[17].mxu0 }
 0x28d   :  { %v628_v8 = vadd.f32 %v902_v4, %v627_v7 }
 0x28e   :  { %v707_v9 = vmax.f32 %v633_v6, 0.0 }
 0x28f   :  { %v706_v10 = vmax.f32 %v628_v8, 0.0  ;;  %v1082_v11 = vpop.f32.mrb[18].mxu0 }
 0x290   :  { %v643_v12 = vadd.f32 %v1082_v11, %v902_v4  ;;  %v637_v13 = vpop.f32.mrb[19].mxu0 }
 0x291   :  { %v1157_v15 = vpack.c.bf16 %v707_v9, %v706_v10  ;;  %v638_v16 = vadd.f32 %v902_v4, %v637_v13 }
 0x292   :  { %v709_v17 = vmax.f32 %v643_v12, 0.0 }
 0x293   :  { %v708_v18 = vmax.f32 %v638_v16, 0.0  ;;  %1159 = vmatpush3.bf16.xpose.msk.msra.mxu1 %vm1393_vm11, %v1157_v15  ;;  %v1085_v19 = vpop.f32.mrb[20].mxu0 }
 0x294   :  { %v653_v20 = vadd.f32 %v1085_v19, %v902_v4  ;;  %v647_v21 = vpop.f32.mrb[21].mxu0  ;;  %1160 = vmatprep.subr.bf16.mxu1 %v1199_v63 }
 0x295   :  { %v1161_v22 = vpack.c.bf16 %v709_v17, %v708_v18  ;;  %v648_v23 = vadd.f32 %v902_v4, %v647_v21 }
 0x296   :  { %v711_v24 = vmax.f32 %v653_v20, 0.0 }
 0x297   :  { %v710_v25 = vmax.f32 %v648_v23, 0.0  ;;  %v1088_v26 = vpop.f32.mrb[22].mxu0 }
 0x298   :  { %v663_v27 = vadd.f32 %v1088_v26, %v902_v4  ;;  %v657_v28 = vpop.f32.mrb[23].mxu0 }
 0x299   :  { %v1165_v29 = vpack.c.bf16 %v711_v24, %v710_v25  ;;  %v658_v30 = vadd.f32 %v902_v4, %v657_v28 }
 0x29a   :  { %v713_v31 = vmax.f32 %v663_v27, 0.0 }
 0x29b   :  { %1163 = vmatpush3.bf16.xpose.msk.msra.mxu1 %vm1393_vm11, %v1161_v22  ;;  %v712_v32 = vmax.f32 %v658_v30, 0.0  ;;  %v1091_v33 = vpop.f32.mrb[24].mxu0 }
 0x29c   :  { %1164 = vmatprep.subr.bf16.mxu1 %v1199_v63  ;;  %v673_v34 = vadd.f32 %v1091_v33, %v902_v4  ;;  %v667_v35 = vpop.f32.mrb[25].mxu0 }
 0x29d   :  { %v1169_v36 = vpack.c.bf16 %v713_v31, %v712_v32  ;;  %v668_v37 = vadd.f32 %v902_v4, %v667_v35 }
 0x29e   :  { %v715_v38 = vmax.f32 %v673_v34, 0.0 }
 0x29f   :  { %v714_v39 = vmax.f32 %v668_v37, 0.0  ;;  %v1094_v40 = vpop.f32.mrb[26].mxu0 }
 0x2a0   :  { %v683_v41 = vadd.f32 %v1094_v40, %v902_v4  ;;  %v677_v42 = vpop.f32.mrb[27].mxu0 }
 0x2a1   :  { %v1173_v43 = vpack.c.bf16 %v715_v38, %v714_v39  ;;  %v678_v44 = vadd.f32 %v902_v4, %v677_v42 }
 0x2a2   :  { %v717_v45 = vmax.f32 %v683_v41, 0.0 }
 0x2a3   :  { %1167 = vmatpush3.bf16.xpose.msk.msra.mxu1 %vm1393_vm11, %v1165_v29  ;;  %v716_v46 = vmax.f32 %v678_v44, 0.0  ;;  %v1097_v47 = vpop.f32.mrb[28].mxu0 }
 0x2a4   :  { %1168 = vmatprep.subr.bf16.mxu1 %v1199_v63  ;;  %v693_v48 = vadd.f32 %v1097_v47, %v902_v4  ;;  %v687_v49 = vpop.f32.mrb[29].mxu0 }
 0x2a5   :  { %v1177_v50 = vpack.c.bf16 %v717_v45, %v716_v46  ;;  %v688_v51 = vadd.f32 %v902_v4, %v687_v49 }
 0x2a6   :  { %v719_v52 = vmax.f32 %v693_v48, 0.0 }
 0x2a7   :  { %v718_v53 = vmax.f32 %v688_v51, 0.0  ;;  %v1100_v54 = vpop.f32.mrb[30].mxu0 }
 0x2a8   :  { %v703_v55 = vadd.f32 %v1100_v54, %v902_v4  ;;  %v697_v56 = vpop.f32.mrb[31].mxu0 }
 0x2a9   :  { %v1181_v57 = vpack.c.bf16 %v719_v52, %v718_v53  ;;  %v698_v58 = vadd.f32 %v902_v4, %v697_v56  ;;  %v732_v4 = vrot.slane %v727_v3, %v731_v2 }
 0x2aa   :  { %v721_v59 = vmax.f32 %v703_v55, 0.0 }
 0x2ab   :  { %1171 = vmatpush3.bf16.xpose.msk.msra.mxu1 %vm1393_vm11, %v1169_v36  ;;  %v720_v60 = vmax.f32 %v698_v58, 0.0 }
 0x2ac   :  { %1172 = vmatprep.subr.bf16.mxu1 %v1199_v63 }
 0x2ad   :  { %v1185_v61 = vpack.c.bf16 %v721_v59, %v720_v60 }
 0x2b3   :  { %1175 = vmatpush3.bf16.xpose.msk.msra.mxu1 %vm1393_vm11, %v1173_v43 }
 0x2b4   :  { %1176 = vmatprep.subr.bf16.mxu1 %v1199_v63 }
 0x2bb   :  { %1179 = vmatpush3.bf16.xpose.msk.msra.mxu1 %vm1393_vm11, %v1177_v50 }
 0x2bc   :  { %1180 = vmatprep.subr.bf16.mxu1 %v1199_v63 }
 0x2c3   :  { %1183 = vmatpush3.bf16.xpose.msk.msra.mxu1 %vm1393_vm11, %v1181_v57 }
 0x2c4   :  { %1184 = vmatprep.subr.bf16.mxu1 %v1199_v63 }
 0x2cb   :  { %1187 = vmatpush3.bf16.xpose.msk.msra.mxu1 %vm1393_vm11, %v1185_v61 }
 0x2d2   :  { %1134 = vmatmul.mubr.msk.f32.vlgmr.msra.gmra.mrb[16].mxu1 %vm733_vm10, %v722_v62 }
 0x3a5   :  { %v851_v5 = vpop.f32.mrb[16].mxu1 }
 0x3a6   :  { %v852_v6 = vadd.f32 %v851_v5, %v732_v4  ;;  %v1135_v7 = vpop.f32.mrb[17].mxu1 }
 0x3a8   :  { %v855_v8 = vsub.f32 0.0, %v852_v6 }
 0x3aa   :  { %v856_v9 = vmul.f32 1.442695, %v855_v8 }
 0x3ac   :  { %1194 = vpow2.f32 %v856_v9 }
 0x3b6   :  { %v1195_v63 = vpop.eup %1194 }
 0x3b7   :  { %v858_v10 = vadd.f32 1.0, %v1195_v63 }
 0x3b9   :  { %1196 = vrcp.f32 %v858_v10 }
 0x3c3   :  { %v1197_v11 = vpop.eup %1196 }
 0x3c4   :  { %861 = vst [vmem:[%s1436_s9] sm:$0x1] %v1197_v11 }

</bundles_post_ra>
